<compile_context>
chip_gen: v7x
topology: tpu7x:2x2x1
jax: 0.10.0
libtpu: 0.0.40
codegen_flags: <defaults>
</compile_context>

<pallas_src>
import functools

import jax
import jax.numpy as jnp
from jax.experimental import pallas as pl
from jax.experimental.pallas import tpu as pltpu

BN_EPS = 1e-5     # PyTorch BatchNorm1d default
LANE = 128        # TPU lane width -- feature axes are padded to multiples of this


def _bn_train_relu(h):
    """BatchNorm1d (training-mode batch stats, gamma=1, beta=0) followed by ReLU."""
    mu = jnp.mean(h, axis=0, keepdims=True)
    var = jnp.mean((h - mu) ** 2, axis=0, keepdims=True)        # biased variance
    return jnp.maximum((h - mu) * jax.lax.rsqrt(var + BN_EPS), 0.0)


def gin_plus_kernel(eps_ref, ba2_ref,                                # SMEM scalars
                    row_e_ref, col_e_ref, row_n_ref,                 # VMEM int32 indices
                    x_ref, ea_ref, vn_ref,                           # VMEM inputs
                    wn_ref, bn_ref, we_ref, be_ref,
                    wa1_ref, ba1_ref, wa2_ref,
                    w1_ref, b1_ref, w2_ref, b2_ref,
                    out_ref):                                        # VMEM output
    dot = functools.partial(jnp.dot, preferred_element_type=jnp.float32)
    num_nodes = x_ref.shape[0]
    num_edges = ea_ref.shape[0]

    # ---- node / edge encoders: Linear -> BN(train) -> ReLU -> Dropout(identity)
    xt = _bn_train_relu(dot(x_ref[...], wn_ref[...]) + bn_ref[...])          # [N, Hp]
    ef = _bn_train_relu(dot(ea_ref[...], we_ref[...]) + be_ref[...])         # [E, Hp]

    # ---- gather via one-hot MXU matmuls (no serial per-edge loop):
    #      node_i = onehot(row) @ xt, node_j = onehot(col) @ xt
    iota_en = jax.lax.broadcasted_iota(jnp.int32, (num_edges, num_nodes), 1)
    gat_i = (iota_en == row_e_ref[...]).astype(jnp.float32)                  # [E, N]
    gat_j = (iota_en == col_e_ref[...]).astype(jnp.float32)                  # [E, N]
    ni = dot(gat_i, xt)                                                      # [E, Hp]
    nj = dot(gat_j, xt)                                                      # [E, Hp]

    # ---- attention head: ONE K=2*Hp contraction on cat([node_i+ef, node_j]),
    #      tanh, then the H->1 projection as a VPU multiply + lane reduction,
    #      LeakyReLU(0.2).
    att_in = jnp.concatenate([ni + ef, nj], axis=-1)                         # [E, 2*Hp]
    a = jnp.tanh(dot(att_in, wa1_ref[...]) + ba1_ref[...])                   # [E, Hp]
    logits = jnp.sum(a * wa2_ref[...], axis=-1, keepdims=True) + ba2_ref[0]  # [E, 1]
    logits = jnp.where(logits > 0, logits, 0.2 * logits)

    # ---- softmax over ALL edges (dim 0), matching F.softmax(., dim=0)
    m = jnp.max(logits, axis=0, keepdims=True)
    p = jnp.exp(logits - m)
    att = p * pl.reciprocal(jnp.sum(p, axis=0, keepdims=True), approx=True)  # [E, 1]

    msg = (nj + ef) * att                                                    # [E, Hp]

    # ---- scatter-add over `row` via one-hot MXU matmul, folded with the
    #      (1+eps)*xt + virtual-node combine (no zero-init / extra pass).
    iota_ne = jax.lax.broadcasted_iota(jnp.int32, (num_nodes, num_edges), 0)
    scat = (iota_ne == row_n_ref[...]).astype(jnp.float32)                   # [N, E]
    out = (1.0 + eps_ref[0]) * xt + dot(scat, msg) + vn_ref[...]             # [N, Hp]

    # ---- MLPLayer: Linear(H->2H) -> BN(train) -> ReLU -> Dropout(id) -> Linear(2H->H)
    h = _bn_train_relu(dot(out, w1_ref[...]) + b1_ref[...])                  # [N, H2p]
    out_ref[...] = dot(h, w2_ref[...]) + b2_ref[...]                         # [N, Hp]


def _pad2(a, rows, cols):
    a = jnp.asarray(a, jnp.float32)
    return jnp.pad(a, ((0, rows - a.shape[0]), (0, cols - a.shape[1])))


def _round_up(n, m):
    return ((n + m - 1) // m) * m


def _vmem_limit_bytes(N, E, Hp, H2p, in_dim, edge_dim):
    """Shape-derived VMEM budget, clamped to the chip's capacity when known."""
    f32 = 4
    live = (3 * N * Hp            # xt / out / h-sized node values
            + 5 * E * Hp          # ef, ni, nj, a, msg
            + E * 2 * Hp          # fused attention input
            + 3 * E * N           # one-hot gather/scatter matrices
            + N * H2p             # MLP hidden
            + N * in_dim + E * edge_dim) * f32
    weights = (2 * Hp * Hp + 2 * Hp * H2p + 16 * Hp) * f32
    need = 2 * (live + weights) + (4 << 20)      # headroom for compiler temps
    cap = 64 * 1024 * 1024                       # conservative (v7x per-TC)
    try:
        cap = int(pltpu.get_tpu_info().vmem_capacity_bytes)
    except Exception:
        pass
    return int(min(max(need, 32 * 1024 * 1024), int(cap * 0.8)))


def gin_plus_layer(x, edge_index, edge_attr, params, virtual_node=None):
    """JAX wrapper: pads hidden axes to 128 lanes and calls the fused kernel."""
    N, in_dim = x.shape
    E, edge_dim = edge_attr.shape
    H = params["wn"].shape[1]
    H2 = params["w1"].shape[1]
    Hp = _round_up(H, LANE)
    H2p = _round_up(H2, LANE)

    row = edge_index[0].astype(jnp.int32)
    col = edge_index[1].astype(jnp.int32)

    # wa1 [2H, H] -> stacked [2*Hp, Hp]: first Hp rows hold wa1[:H], next Hp rows
    # hold wa1[H:]; everything else zero (inert padding).
    wa1 = jnp.asarray(params["wa1"], jnp.float32)
    wa1_stacked = jnp.zeros((2 * Hp, Hp), jnp.float32)
    wa1_stacked = wa1_stacked.at[:H, :H].set(wa1[:H])
    wa1_stacked = wa1_stacked.at[Hp:Hp + H, :H].set(wa1[H:])

    if virtual_node is None:
        vn = jnp.zeros((1, Hp), jnp.float32)
    else:
        vn = _pad2(jnp.reshape(virtual_node, (1, H)), 1, Hp)

    ins = (
        # SMEM (scalar path)
        jnp.reshape(params["eps"], (1,)).astype(jnp.float32),
        jnp.reshape(params["ba2"], (1,)).astype(jnp.float32),
        # VMEM int32 edge indices (two layouts: [E,1] for gather, [1,E] for scatter)
        row.reshape(E, 1), col.reshape(E, 1), row.reshape(1, E),
        # VMEM tensors (hidden axes zero-padded to lane width -> lane-dense)
        x.astype(jnp.float32), edge_attr.astype(jnp.float32), vn,
        _pad2(params["wn"], in_dim, Hp), _pad2(params["bn"], 1, Hp),
        _pad2(params["we"], edge_dim, Hp), _pad2(params["be"], 1, Hp),
        wa1_stacked,
        _pad2(params["ba1"], 1, Hp), _pad2(params["wa2"].T, 1, Hp),
        _pad2(params["w1"], Hp, H2p), _pad2(params["b1"], 1, H2p),
        _pad2(params["w2"], H2p, Hp), _pad2(params["b2"], 1, Hp),
    )

    smem = pl.BlockSpec(memory_space=pltpu.MemorySpace.SMEM)
    vmem = pl.BlockSpec(memory_space=pltpu.MemorySpace.VMEM)
    in_specs = [smem] * 2 + [vmem] * (len(ins) - 2)

    # Advisory cost hint for the XLA scheduler around the custom call.
    flops = 2 * (N * in_dim * Hp + E * edge_dim * Hp
                 + 2 * E * N * Hp                 # one-hot gathers
                 + E * (2 * Hp) * Hp              # fused attention matmul
                 + N * E * Hp                     # one-hot scatter
                 + N * Hp * H2p + N * H2p * Hp) + 10 * (N + E) * Hp
    transcendentals = E * Hp + E + 2 * Hp + H2p
    bytes_accessed = sum(int(a.size) * a.dtype.itemsize for a in ins) + N * Hp * 4

    out_padded = pl.pallas_call(
        gin_plus_kernel,
        out_shape=jax.ShapeDtypeStruct((N, Hp), jnp.float32),
        in_specs=in_specs,
        out_specs=vmem,
        compiler_params=pltpu.CompilerParams(
            vmem_limit_bytes=_vmem_limit_bytes(N, E, Hp, H2p, in_dim, edge_dim)),
        cost_estimate=pl.CostEstimate(flops=int(flops),
                                      transcendentals=int(transcendentals),
                                      bytes_accessed=int(bytes_accessed)),
    )(*ins)
    return out_padded[:, :H]


def gin_plus_reference(x, edge_index, edge_attr, params, virtual_node=None):
    """Pure-JAX reference matching the PyTorch forward (train-init BN, no dropout)."""
    mm = functools.partial(jnp.dot, precision=jax.lax.Precision.HIGHEST)

    def bn_relu(h):
        mu = jnp.mean(h, axis=0, keepdims=True)
        var = jnp.mean((h - mu) ** 2, axis=0, keepdims=True)
        return jnp.maximum((h - mu) / jnp.sqrt(var + BN_EPS), 0.0)

    xt = bn_relu(mm(x, params["wn"]) + params["bn"])
    ef = bn_relu(mm(edge_attr, params["we"]) + params["be"])
    row, col = edge_index[0], edge_index[1]
    ni, nj = xt[row], xt[col]
    a = mm(jnp.tanh(mm(jnp.concatenate([ni + ef, nj], axis=-1), params["wa1"])
                    + params["ba1"]), params["wa2"]) + params["ba2"]
    a = jnp.where(a > 0, a, 0.2 * a)
    att = jax.nn.softmax(a, axis=0)
    msg = (nj + ef) * att
    agg = jnp.zeros_like(xt).at[row].add(msg)
    if virtual_node is not None:
        agg = agg + jnp.reshape(virtual_node, (1, -1))
    out = (1.0 + params["eps"]) * xt + agg
    h = bn_relu(mm(out, params["w1"]) + params["b1"])
    return mm(h, params["w2"]) + params["b2"]


if __name__ == "__main__":
    key = jax.random.PRNGKey(0)
    N, E = 16, 48
    in_dim, hidden_dim, edge_dim = 8, 32, 4

    keys = jax.random.split(key, 16)

    def init(k, shape, fan_in):
        bound = 1.0 / (fan_in ** 0.5)
        return jax.random.uniform(k, shape, jnp.float32, -bound, bound)

    # Linear weights stored as [in, out] (pre-transposed vs. PyTorch [out, in]).
    params = dict(
        wn=init(keys[0], (in_dim, hidden_dim), in_dim),
        bn=init(keys[1], (1, hidden_dim), in_dim),
        we=init(keys[2], (edge_dim, hidden_dim), edge_dim),
        be=init(keys[3], (1, hidden_dim), edge_dim),
        wa1=init(keys[4], (2 * hidden_dim, hidden_dim), 2 * hidden_dim),
        ba1=init(keys[5], (1, hidden_dim), 2 * hidden_dim),
        wa2=init(keys[6], (hidden_dim, 1), hidden_dim),
        ba2=init(keys[7], (1,), hidden_dim),
        w1=init(keys[8], (hidden_dim, 2 * hidden_dim), hidden_dim),
        b1=init(keys[9], (1, 2 * hidden_dim), hidden_dim),
        w2=init(keys[10], (2 * hidden_dim, hidden_dim), 2 * hidden_dim),
        b2=init(keys[11], (1, hidden_dim), 2 * hidden_dim),
        eps=jnp.zeros((1,), jnp.float32),   # nn.Parameter(torch.zeros(1))
    )

    x = jax.random.normal(keys[12], (N, in_dim), jnp.float32)
    edge_attr = jax.random.normal(keys[13], (E, edge_dim), jnp.float32)
    edge_index = jax.random.randint(keys[14], (2, E), 0, N, dtype=jnp.int32)

    out = gin_plus_layer(x, edge_index, edge_attr, params, virtual_node=None)
    out = jax.block_until_ready(out)
    ref = gin_plus_reference(x, edge_index, edge_attr, params, virtual_node=None)

    assert out.shape == (N, hidden_dim), out.shape
    assert bool(jnp.all(jnp.isfinite(out)))
    assert float(jnp.max(jnp.abs(out - ref))) < 5e-2
    print("KERNEL_OK")
</pallas_src>

<mosaic_0001>
module attributes {stable_mosaic.version = 11 : i64} {
  func.func @gin_plus_kernel(%arg0: memref<1xf32, #tpu.memory_space<smem>>, %arg1: memref<1xf32, #tpu.memory_space<smem>>, %arg2: memref<48x1xi32, #tpu.memory_space<vmem>>, %arg3: memref<48x1xi32, #tpu.memory_space<vmem>>, %arg4: memref<1x48xi32, #tpu.memory_space<vmem>>, %arg5: memref<16x8xf32, #tpu.memory_space<vmem>>, %arg6: memref<48x4xf32, #tpu.memory_space<vmem>>, %arg7: memref<1x128xf32, #tpu.memory_space<vmem>>, %arg8: memref<8x128xf32, #tpu.memory_space<vmem>>, %arg9: memref<1x128xf32, #tpu.memory_space<vmem>>, %arg10: memref<4x128xf32, #tpu.memory_space<vmem>>, %arg11: memref<1x128xf32, #tpu.memory_space<vmem>>, %arg12: memref<256x128xf32, #tpu.memory_space<vmem>>, %arg13: memref<1x128xf32, #tpu.memory_space<vmem>>, %arg14: memref<1x128xf32, #tpu.memory_space<vmem>>, %arg15: memref<128x128xf32, #tpu.memory_space<vmem>>, %arg16: memref<1x128xf32, #tpu.memory_space<vmem>>, %arg17: memref<128x128xf32, #tpu.memory_space<vmem>>, %arg18: memref<1x128xf32, #tpu.memory_space<vmem>>, %arg19: memref<16x128xf32, #tpu.memory_space<vmem>>) attributes {dimension_semantics = [], scalar_prefetch = 0 : i64, scratch_operands = 0 : i64, tpu.core_type = #tpu.core_type<tc>} {
    %c0 = arith.constant 0 : index
    %c0_0 = arith.constant 0 : index
    %0 = vector.load %arg5[%c0, %c0_0] : memref<16x8xf32, #tpu.memory_space<vmem>>, vector<16x8xf32>
    %c0_1 = arith.constant 0 : index
    %c0_2 = arith.constant 0 : index
    %1 = vector.load %arg8[%c0_1, %c0_2] : memref<8x128xf32, #tpu.memory_space<vmem>>, vector<8x128xf32>
    %cst = arith.constant dense<0.000000e+00> : vector<16x128xf32>
    %2 = tpu.matmul %0, %1, %cst {dimension_numbers = #tpu.dot_dimension_numbers<[1], [0], [0], [1], [0, 0, 1, 1], [], []>} : vector<16x8xf32>, vector<8x128xf32>, vector<16x128xf32> -> vector<16x128xf32>
    %c0_3 = arith.constant 0 : index
    %c0_4 = arith.constant 0 : index
    %3 = vector.load %arg9[%c0_3, %c0_4] : memref<1x128xf32, #tpu.memory_space<vmem>>, vector<1x128xf32>
    %4 = vector.broadcast %3 : vector<1x128xf32> to vector<16x128xf32>
    %5 = arith.addf %2, %4 : vector<16x128xf32>
    %cst_5 = arith.constant dense<0.000000e+00> : vector<128xf32>
    %6 = vector.multi_reduction <add>, %5, %cst_5 [0] : vector<16x128xf32> to vector<128xf32>
    %7 = vector.shape_cast %6 : vector<128xf32> to vector<1x128xf32>
    %cst_6 = arith.constant 1.600000e+01 : f32
    %8 = vector.broadcast %cst_6 : f32 to vector<1x128xf32>
    %9 = arith.divf %7, %8 : vector<1x128xf32>
    %10 = vector.broadcast %9 : vector<1x128xf32> to vector<16x128xf32>
    %11 = arith.subf %5, %10 : vector<16x128xf32>
    %12 = arith.mulf %11, %11 : vector<16x128xf32>
    %cst_7 = arith.constant dense<0.000000e+00> : vector<128xf32>
    %13 = vector.multi_reduction <add>, %12, %cst_7 [0] : vector<16x128xf32> to vector<128xf32>
    %14 = vector.shape_cast %13 : vector<128xf32> to vector<1x128xf32>
    %cst_8 = arith.constant 1.600000e+01 : f32
    %15 = vector.broadcast %cst_8 : f32 to vector<1x128xf32>
    %16 = arith.divf %14, %15 : vector<1x128xf32>
    %17 = vector.broadcast %9 : vector<1x128xf32> to vector<16x128xf32>
    %18 = arith.subf %5, %17 : vector<16x128xf32>
    %cst_9 = arith.constant 9.99999974E-6 : f32
    %19 = vector.broadcast %cst_9 : f32 to vector<1x128xf32>
    %20 = arith.addf %16, %19 : vector<1x128xf32>
    %21 = math.rsqrt %20 : vector<1x128xf32>
    %22 = vector.broadcast %21 : vector<1x128xf32> to vector<16x128xf32>
    %23 = arith.mulf %18, %22 : vector<16x128xf32>
    %cst_10 = arith.constant 0.000000e+00 : f32
    %24 = vector.broadcast %cst_10 : f32 to vector<16x128xf32>
    %25 = arith.maximumf %23, %24 : vector<16x128xf32>
    %c0_11 = arith.constant 0 : index
    %c0_12 = arith.constant 0 : index
    %26 = vector.load %arg6[%c0_11, %c0_12] : memref<48x4xf32, #tpu.memory_space<vmem>>, vector<48x4xf32>
    %c0_13 = arith.constant 0 : index
    %c0_14 = arith.constant 0 : index
    %27 = vector.load %arg10[%c0_13, %c0_14] : memref<4x128xf32, #tpu.memory_space<vmem>>, vector<4x128xf32>
    %cst_15 = arith.constant dense<0.000000e+00> : vector<48x128xf32>
    %28 = tpu.matmul %26, %27, %cst_15 {dimension_numbers = #tpu.dot_dimension_numbers<[1], [0], [0], [1], [0, 0, 1, 1], [], []>} : vector<48x4xf32>, vector<4x128xf32>, vector<48x128xf32> -> vector<48x128xf32>
    %c0_16 = arith.constant 0 : index
    %c0_17 = arith.constant 0 : index
    %29 = vector.load %arg11[%c0_16, %c0_17] : memref<1x128xf32, #tpu.memory_space<vmem>>, vector<1x128xf32>
    %30 = vector.broadcast %29 : vector<1x128xf32> to vector<48x128xf32>
    %31 = arith.addf %28, %30 : vector<48x128xf32>
    %cst_18 = arith.constant dense<0.000000e+00> : vector<128xf32>
    %32 = vector.multi_reduction <add>, %31, %cst_18 [0] : vector<48x128xf32> to vector<128xf32>
    %33 = vector.shape_cast %32 : vector<128xf32> to vector<1x128xf32>
    %cst_19 = arith.constant 4.800000e+01 : f32
    %34 = vector.broadcast %cst_19 : f32 to vector<1x128xf32>
    %35 = arith.divf %33, %34 : vector<1x128xf32>
    %36 = vector.broadcast %35 : vector<1x128xf32> to vector<48x128xf32>
    %37 = arith.subf %31, %36 : vector<48x128xf32>
    %38 = arith.mulf %37, %37 : vector<48x128xf32>
    %cst_20 = arith.constant dense<0.000000e+00> : vector<128xf32>
    %39 = vector.multi_reduction <add>, %38, %cst_20 [0] : vector<48x128xf32> to vector<128xf32>
    %40 = vector.shape_cast %39 : vector<128xf32> to vector<1x128xf32>
    %cst_21 = arith.constant 4.800000e+01 : f32
    %41 = vector.broadcast %cst_21 : f32 to vector<1x128xf32>
    %42 = arith.divf %40, %41 : vector<1x128xf32>
    %43 = vector.broadcast %35 : vector<1x128xf32> to vector<48x128xf32>
    %44 = arith.subf %31, %43 : vector<48x128xf32>
    %cst_22 = arith.constant 9.99999974E-6 : f32
    %45 = vector.broadcast %cst_22 : f32 to vector<1x128xf32>
    %46 = arith.addf %42, %45 : vector<1x128xf32>
    %47 = math.rsqrt %46 : vector<1x128xf32>
    %48 = vector.broadcast %47 : vector<1x128xf32> to vector<48x128xf32>
    %49 = arith.mulf %44, %48 : vector<48x128xf32>
    %cst_23 = arith.constant 0.000000e+00 : f32
    %50 = vector.broadcast %cst_23 : f32 to vector<48x128xf32>
    %51 = arith.maximumf %49, %50 : vector<48x128xf32>
    %52 = tpu.iota {dimensions = array<i32: 1>} : vector<48x16xi32>
    %c0_24 = arith.constant 0 : index
    %c0_25 = arith.constant 0 : index
    %53 = vector.load %arg2[%c0_24, %c0_25] : memref<48x1xi32, #tpu.memory_space<vmem>>, vector<48x1xi32>
    %54 = vector.broadcast %53 : vector<48x1xi32> to vector<48x16xi32>
    %55 = arith.cmpi eq, %52, %54 : vector<48x16xi32>
    %56 = arith.extui %55 : vector<48x16xi1> to vector<48x16xi32>
    %57 = arith.sitofp %56 : vector<48x16xi32> to vector<48x16xf32>
    %c0_26 = arith.constant 0 : index
    %c0_27 = arith.constant 0 : index
    %58 = vector.load %arg3[%c0_26, %c0_27] : memref<48x1xi32, #tpu.memory_space<vmem>>, vector<48x1xi32>
    %59 = vector.broadcast %58 : vector<48x1xi32> to vector<48x16xi32>
    %60 = arith.cmpi eq, %52, %59 : vector<48x16xi32>
    %61 = arith.extui %60 : vector<48x16xi1> to vector<48x16xi32>
    %62 = arith.sitofp %61 : vector<48x16xi32> to vector<48x16xf32>
    %cst_28 = arith.constant dense<0.000000e+00> : vector<48x128xf32>
    %63 = tpu.matmul %57, %25, %cst_28 {dimension_numbers = #tpu.dot_dimension_numbers<[1], [0], [0], [1], [0, 0, 1, 1], [], []>} : vector<48x16xf32>, vector<16x128xf32>, vector<48x128xf32> -> vector<48x128xf32>
    %cst_29 = arith.constant dense<0.000000e+00> : vector<48x128xf32>
    %64 = tpu.matmul %62, %25, %cst_29 {dimension_numbers = #tpu.dot_dimension_numbers<[1], [0], [0], [1], [0, 0, 1, 1], [], []>} : vector<48x16xf32>, vector<16x128xf32>, vector<48x128xf32> -> vector<48x128xf32>
    %65 = arith.addf %63, %51 : vector<48x128xf32>
    %66 = tpu.concatenate %65, %64 in 1 : vector<48x128xf32>, vector<48x128xf32> -> vector<48x256xf32>
    %c0_30 = arith.constant 0 : index
    %c0_31 = arith.constant 0 : index
    %67 = vector.load %arg12[%c0_30, %c0_31] : memref<256x128xf32, #tpu.memory_space<vmem>>, vector<256x128xf32>
    %cst_32 = arith.constant dense<0.000000e+00> : vector<48x128xf32>
    %68 = tpu.matmul %66, %67, %cst_32 {dimension_numbers = #tpu.dot_dimension_numbers<[1], [0], [0], [1], [0, 0, 1, 1], [], []>} : vector<48x256xf32>, vector<256x128xf32>, vector<48x128xf32> -> vector<48x128xf32>
    %c0_33 = arith.constant 0 : index
    %c0_34 = arith.constant 0 : index
    %69 = vector.load %arg13[%c0_33, %c0_34] : memref<1x128xf32, #tpu.memory_space<vmem>>, vector<1x128xf32>
    %70 = vector.broadcast %69 : vector<1x128xf32> to vector<48x128xf32>
    %71 = arith.addf %68, %70 : vector<48x128xf32>
    %72 = math.tanh %71 : vector<48x128xf32>
    %c0_35 = arith.constant 0 : index
    %c0_36 = arith.constant 0 : index
    %73 = vector.load %arg14[%c0_35, %c0_36] : memref<1x128xf32, #tpu.memory_space<vmem>>, vector<1x128xf32>
    %74 = vector.broadcast %73 : vector<1x128xf32> to vector<48x128xf32>
    %75 = arith.mulf %72, %74 : vector<48x128xf32>
    %cst_37 = arith.constant dense<0.000000e+00> : vector<48xf32>
    %76 = vector.multi_reduction <add>, %75, %cst_37 [1] : vector<48x128xf32> to vector<48xf32>
    %77 = vector.shape_cast %76 : vector<48xf32> to vector<48x1xf32>
    %c0_38 = arith.constant 0 : index
    %78 = memref.load %arg1[%c0_38] : memref<1xf32, #tpu.memory_space<smem>>
    %79 = vector.broadcast %78 : f32 to vector<48x1xf32>
    %80 = arith.addf %77, %79 : vector<48x1xf32>
    %cst_39 = arith.constant 0.000000e+00 : f32
    %81 = vector.broadcast %cst_39 : f32 to vector<48x1xf32>
    %82 = arith.cmpf ogt, %80, %81 : vector<48x1xf32>
    %cst_40 = arith.constant 2.000000e-01 : f32
    %83 = vector.broadcast %cst_40 : f32 to vector<48x1xf32>
    %84 = arith.mulf %83, %80 : vector<48x1xf32>
    %85 = arith.select %82, %80, %84 : vector<48x1xi1>, vector<48x1xf32>
    %cst_41 = arith.constant dense<0xFF800000> : vector<1xf32>
    %86 = vector.multi_reduction <maximumf>, %85, %cst_41 [0] : vector<48x1xf32> to vector<1xf32>
    %87 = vector.shape_cast %86 : vector<1xf32> to vector<1x1xf32>
    %88 = vector.broadcast %87 : vector<1x1xf32> to vector<48x1xf32>
    %89 = arith.subf %85, %88 : vector<48x1xf32>
    %90 = math.exp %89 : vector<48x1xf32>
    %cst_42 = arith.constant dense<0.000000e+00> : vector<1xf32>
    %91 = vector.multi_reduction <add>, %90, %cst_42 [0] : vector<48x1xf32> to vector<1xf32>
    %92 = vector.shape_cast %91 : vector<1xf32> to vector<1x1xf32>
    %93 = tpu.reciprocal %92 {approx = true} : vector<1x1xf32> -> vector<1x1xf32>
    %94 = vector.broadcast %93 : vector<1x1xf32> to vector<48x1xf32>
    %95 = arith.mulf %90, %94 : vector<48x1xf32>
    %96 = arith.addf %64, %51 : vector<48x128xf32>
    %97 = vector.broadcast %95 : vector<48x1xf32> to vector<48x128xf32>
    %98 = arith.mulf %96, %97 : vector<48x128xf32>
    %99 = tpu.iota {dimensions = array<i32: 0>} : vector<16x48xi32>
    %c0_43 = arith.constant 0 : index
    %c0_44 = arith.constant 0 : index
    %100 = vector.load %arg4[%c0_43, %c0_44] : memref<1x48xi32, #tpu.memory_space<vmem>>, vector<1x48xi32>
    %101 = vector.broadcast %100 : vector<1x48xi32> to vector<16x48xi32>
    %102 = arith.cmpi eq, %99, %101 : vector<16x48xi32>
    %103 = arith.extui %102 : vector<16x48xi1> to vector<16x48xi32>
    %104 = arith.sitofp %103 : vector<16x48xi32> to vector<16x48xf32>
    %c0_45 = arith.constant 0 : index
    %105 = memref.load %arg0[%c0_45] : memref<1xf32, #tpu.memory_space<smem>>
    %cst_46 = arith.constant 1.000000e+00 : f32
    %106 = arith.addf %cst_46, %105 : f32
    %107 = vector.broadcast %106 : f32 to vector<16x128xf32>
    %108 = arith.mulf %107, %25 : vector<16x128xf32>
    %cst_47 = arith.constant dense<0.000000e+00> : vector<16x128xf32>
    %109 = tpu.matmul %104, %98, %cst_47 {dimension_numbers = #tpu.dot_dimension_numbers<[1], [0], [0], [1], [0, 0, 1, 1], [], []>} : vector<16x48xf32>, vector<48x128xf32>, vector<16x128xf32> -> vector<16x128xf32>
    %110 = arith.addf %108, %109 : vector<16x128xf32>
    %c0_48 = arith.constant 0 : index
    %c0_49 = arith.constant 0 : index
    %111 = vector.load %arg7[%c0_48, %c0_49] : memref<1x128xf32, #tpu.memory_space<vmem>>, vector<1x128xf32>
    %112 = vector.broadcast %111 : vector<1x128xf32> to vector<16x128xf32>
    %113 = arith.addf %110, %112 : vector<16x128xf32>
    %c0_50 = arith.constant 0 : index
    %c0_51 = arith.constant 0 : index
    %114 = vector.load %arg15[%c0_50, %c0_51] : memref<128x128xf32, #tpu.memory_space<vmem>>, vector<128x128xf32>
    %cst_52 = arith.constant dense<0.000000e+00> : vector<16x128xf32>
    %115 = tpu.matmul %113, %114, %cst_52 {dimension_numbers = #tpu.dot_dimension_numbers<[1], [0], [0], [1], [0, 0, 1, 1], [], []>} : vector<16x128xf32>, vector<128x128xf32>, vector<16x128xf32> -> vector<16x128xf32>
    %c0_53 = arith.constant 0 : index
    %c0_54 = arith.constant 0 : index
    %116 = vector.load %arg16[%c0_53, %c0_54] : memref<1x128xf32, #tpu.memory_space<vmem>>, vector<1x128xf32>
    %117 = vector.broadcast %116 : vector<1x128xf32> to vector<16x128xf32>
    %118 = arith.addf %115, %117 : vector<16x128xf32>
    %cst_55 = arith.constant dense<0.000000e+00> : vector<128xf32>
    %119 = vector.multi_reduction <add>, %118, %cst_55 [0] : vector<16x128xf32> to vector<128xf32>
    %120 = vector.shape_cast %119 : vector<128xf32> to vector<1x128xf32>
    %cst_56 = arith.constant 1.600000e+01 : f32
    %121 = vector.broadcast %cst_56 : f32 to vector<1x128xf32>
    %122 = arith.divf %120, %121 : vector<1x128xf32>
    %123 = vector.broadcast %122 : vector<1x128xf32> to vector<16x128xf32>
    %124 = arith.subf %118, %123 : vector<16x128xf32>
    %125 = arith.mulf %124, %124 : vector<16x128xf32>
    %cst_57 = arith.constant dense<0.000000e+00> : vector<128xf32>
    %126 = vector.multi_reduction <add>, %125, %cst_57 [0] : vector<16x128xf32> to vector<128xf32>
    %127 = vector.shape_cast %126 : vector<128xf32> to vector<1x128xf32>
    %cst_58 = arith.constant 1.600000e+01 : f32
    %128 = vector.broadcast %cst_58 : f32 to vector<1x128xf32>
    %129 = arith.divf %127, %128 : vector<1x128xf32>
    %130 = vector.broadcast %122 : vector<1x128xf32> to vector<16x128xf32>
    %131 = arith.subf %118, %130 : vector<16x128xf32>
    %cst_59 = arith.constant 9.99999974E-6 : f32
    %132 = vector.broadcast %cst_59 : f32 to vector<1x128xf32>
    %133 = arith.addf %129, %132 : vector<1x128xf32>
    %134 = math.rsqrt %133 : vector<1x128xf32>
    %135 = vector.broadcast %134 : vector<1x128xf32> to vector<16x128xf32>
    %136 = arith.mulf %131, %135 : vector<16x128xf32>
    %cst_60 = arith.constant 0.000000e+00 : f32
    %137 = vector.broadcast %cst_60 : f32 to vector<16x128xf32>
    %138 = arith.maximumf %136, %137 : vector<16x128xf32>
    %c0_61 = arith.constant 0 : index
    %c0_62 = arith.constant 0 : index
    %139 = vector.load %arg17[%c0_61, %c0_62] : memref<128x128xf32, #tpu.memory_space<vmem>>, vector<128x128xf32>
    %cst_63 = arith.constant dense<0.000000e+00> : vector<16x128xf32>
    %140 = tpu.matmul %138, %139, %cst_63 {dimension_numbers = #tpu.dot_dimension_numbers<[1], [0], [0], [1], [0, 0, 1, 1], [], []>} : vector<16x128xf32>, vector<128x128xf32>, vector<16x128xf32> -> vector<16x128xf32>
    %c0_64 = arith.constant 0 : index
    %c0_65 = arith.constant 0 : index
    %141 = vector.load %arg18[%c0_64, %c0_65] : memref<1x128xf32, #tpu.memory_space<vmem>>, vector<1x128xf32>
    %142 = vector.broadcast %141 : vector<1x128xf32> to vector<16x128xf32>
    %143 = arith.addf %140, %142 : vector<16x128xf32>
    %c0_66 = arith.constant 0 : index
    %c0_67 = arith.constant 0 : index
    %144 = vector.load %arg19[%c0_66, %c0_67] : memref<16x128xf32, #tpu.memory_space<vmem>>, vector<16x128xf32>
    tpu.vector_store %arg19[%c0_66, %c0_67], %143 {strides = array<i32>} : memref<16x128xf32, #tpu.memory_space<vmem>>, vector<16x128xf32>,
    return
  }
}

</mosaic_0001>

<bundles_post_ra>
// kernel: tpu_custom_call.1
= control target key start
LH: loop header
LB: loop body
LE: loop exit
PB: predicated region body
PF: predicated region fallthrough
CT: control target
= control target key end

     0   :  { %s2255_s0 = inlined_call_operand.<no memory space> [shape: f32[1], index: 0, kind: input, shape index: {}]   ;;  %s2256_s1 = inlined_call_operand.<no memory space> [shape: f32[1], index: 1, kind: input, shape index: {}]   ;;  %s2257_s2 = inlined_call_operand.vmem [shape: s32[48,1], index: 2, kind: input, shape index: {}]   ;;  %s2258_s3 = inlined_call_operand.vmem [shape: s32[48,1], index: 3, kind: input, shape index: {}]   ;;  %s2259_s4 = inlined_call_operand.vmem [shape: s32[1,48], index: 4, kind: input, shape index: {}]   ;;  %s2260_s5 = inlined_call_operand.vmem [shape: f32[16,8], index: 5, kind: input, shape index: {}]   ;;  %s2261_s6 = inlined_call_operand.vmem [shape: f32[48,4], index: 6, kind: input, shape index: {}]   ;;  %s2262_s7 = inlined_call_operand.vmem [shape: f32[1,128], index: 7, kind: input, shape index: {}]   ;;  %s2263_s8 = inlined_call_operand.vmem [shape: f32[8,128], index: 8, kind: input, shape index: {}]   ;;  %s2264_s9 = inlined_call_operand.vmem [shape: f32[1,128], index: 9, kind: input, shape index: {}]   ;;  %s2265_s10 = inlined_call_operand.vmem [shape: f32[4,128], index: 10, kind: input, shape index: {}]   ;;  %s2266_s11 = inlined_call_operand.vmem [shape: f32[1,128], index: 11, kind: input, shape index: {}]   ;;  %s2267_s12 = inlined_call_operand.hbm [shape: f32[256,128], index: 12, kind: input, shape index: {}]   ;;  %s2268_s13 = inlined_call_operand.vmem [shape: f32[1,128], index: 13, kind: input, shape index: {}]   ;;  %s2269_s14 = inlined_call_operand.vmem [shape: f32[1,128], index: 14, kind: input, shape index: {}]   ;;  %s2270_s15 = inlined_call_operand.vmem [shape: f32[128,128], index: 15, kind: input, shape index: {}]   ;;  %s2271_s16 = inlined_call_operand.vmem [shape: f32[1,128], index: 16, kind: input, shape index: {}]   ;;  %s2272_s17 = inlined_call_operand.hbm [shape: f32[128,128], index: 17, kind: input, shape index: {}]   ;;  %s2273_s18 = inlined_call_operand.vmem [shape: f32[1,128], index: 18, kind: input, shape index: {}]   ;;  %s2274_s19 = inlined_call_operand.hbm [shape: f32[16,128], index: 19, kind: output, shape index: {}]  }
   0x1   :  { %2277 = sst [smem:[#allocation13_spill]] %s2255_s0 }
   0x2   :  { %2278 = sst [smem:[#allocation14_spill]] %s2256_s1 }
   0x3   :  { %2279 = sst [smem:[#allocation15_spill]] %s2257_s2 }
   0x4   :  { %2280 = sst [smem:[#allocation16_spill]] %s2258_s3 }
   0x5   :  { %26 = vsyncpa [#allocation5], 0 }
   0x6   :  { %27 = vsyncpa [#allocation8], 0 }
   0x7   :  { %28 = vsyncpa [#allocation6], 0  ;;  %s1833_s0 = smov [#allocation4]   ;;  %s1761_s1 = scalar_lea.hbm %s2267_s12, 4096 }
   0x8   :  { %s58_s30 = sshll.u32 %s1833_s0, 4  ;;  %p1762_p0 = scmp.ne.s32.totalorder %s2267_s12, %s1761_s1  ;;  %s59_s30 = int_to_ptr.vmem [resolvable:$true] %s58_s30 }
   0x9   :  { %p1765_p1 = scmp.lt.u32.totalorder %s1761_s1, %s2267_s12 }
   0xb   :  { %p1767_p2 = pnand %p1765_p1, %p1762_p0 }
   0xd   :  { %1770 = shalt.err (!%p1767_p2)
}
   0xe   :  { %s1771_s25 = scalar_lea.vmem %s59_s30, 4096  ;;  %p1776_p4 = scmp.lt.s32.totalorder %s59_s30, %s59_s30 }
   0xf   :  { %p1772_p3 = scmp.ne.s32.totalorder %s59_s30, %s1771_s25  ;;  %p1777_p5 = scmp.lt.s32.totalorder %s1771_s25, %s1771_s25 }
  0x11   :  { %p1778_p6 = por %p1777_p5, %p1776_p4 }
  0x13   :  { %p1779_p7 = pnand %p1778_p6, %p1772_p3 }
  0x15   :  { %1782 = shalt.err (!%p1779_p7)
}
  0x16   :  { %s1834_s3 = smov 128   ;;  %s1835_s26 = smov 8  }
  0x17   :  { %64 = dma.hbm_to_vmem [thread:$0]  %s2267_s12, 4096, %s59_s30, [#allocation5], %s1834_s3, %s1834_s3, %s1835_s26  }
  0x18   :  { %s1836_s29 = smov [#allocation7]   ;;  %s1783_s1 = scalar_lea.hbm %s2272_s17, 2048 }
  0x19   :  { %s78_s0 = sshll.u32 %s1836_s29, 4  ;;  %p1784_p8 = scmp.ne.s32.totalorder %s2272_s17, %s1783_s1  ;;  %s79_s0 = int_to_ptr.vmem [resolvable:$true] %s78_s0 }
  0x1a   :  { %p1787_p9 = scmp.lt.u32.totalorder %s1783_s1, %s2272_s17 }
  0x1c   :  { %p1789_p10 = pnand %p1787_p9, %p1784_p8 }
  0x1e   :  { %1792 = shalt.err (!%p1789_p10)
}
  0x1f   :  { %s1793_s25 = scalar_lea.vmem %s79_s0, 2048  ;;  %p1798_p12 = scmp.lt.s32.totalorder %s79_s0, %s79_s0 }
  0x20   :  { %p1794_p11 = scmp.ne.s32.totalorder %s79_s0, %s1793_s25  ;;  %p1799_p13 = scmp.lt.s32.totalorder %s1793_s25, %s1793_s25 }
  0x22   :  { %p1800_p0 = por %p1799_p13, %p1798_p12 }
  0x24   :  { %p1801_p1 = pnand %p1800_p0, %p1794_p11 }
  0x26   :  { %1804 = shalt.err (!%p1801_p1)
}
  0x27   :  { %84 = dma.hbm_to_vmem [thread:$0]  %s2272_s17, 2048, %s79_s0, [#allocation8], %s1834_s3, %s1834_s3, %s1835_s26  }
  0x28   :  { %1827 = dma.done.wait [#allocation5], 4096  }
  0x29   :  { %1828 = vsyncadd [#allocation5], 4294963200 }
  0x2a   :  { %1829 = dma.done.wait [#allocation8], 2048  }
  0x2b   :  { %1830 = vsyncadd [#allocation8], 4294965248  ;;  %v1837_v0 = vmov 0   ;;  %vm103_vm0 = vcmask 64512   ;;  %v95_v1 = vld [vmem:[%s2263_s8] sm:$0xff]  ;;  %v94_v3 = vld [vmem:[%s2260_s5 + $0x8] sm:$0xff]  ;;  %v395_v23 = vlaneseq }
  0x2c   :  { %1727 = vset.pattern.permute.xlu0 %v1837_v0  ;;  %1728 = vset.pattern.permute.xlu1 %v1837_v0  ;;  %v93_v2 = vld [vmem:[%s2260_s5] sm:$0xff]  ;;  %s2281_s22 = sld [smem:[#allocation15_spill]]  ;;  %s2282_s24 = sld [smem:[#allocation16_spill]]  ;;  %vm245_vm1 = vcmask 1043456   ;;  %vm226_vm2 = vcmask 31744   ;;  %v213_v10 = vld [vmem:[%s2261_s6 + $0x8] sm:$0xff] }
  0x2d   :  { %1477 = vmatprep.subr.mxu1 %v95_v1  ;;  %1479 = vmatprep.mubr.msk.f32.mxu1 %vm103_vm0, %v93_v2  ;;  %v218_v7 = vld [vmem:[%s2265_s10] sm:$0xf]  ;;  %v214_v11 = vld [vmem:[%s2261_s6 + $0x10] sm:$0xff]  ;;  %v215_v14 = vld [vmem:[%s2261_s6 + $0x18] sm:$0xff]  ;;  %v2043_v24 = vand.u32 127, %v395_v23  ;;  %v1838_v27 = vmov 0.0  }
  0x2e   :  { %1478 = vmatpush3.msra.mxu1 %v95_v1  ;;  %v212_v9 = vld [vmem:[%s2261_s6] sm:$0xff]  ;;  %v217_v18 = vld [vmem:[%s2261_s6 + $0x28] sm:$0xff]  ;;  %vm481_vm5 = vcmask 130048   ;;  %s2283_s29 = sld [smem:[#allocation14_spill]] }
  0x2f   :  { %1480 = vmatmul.mubr.msk.f32.vlgmr.msra.gmra.mrb[0].mxu1 %vm103_vm0, %v94_v3  ;;  %1482 = vmatprep.subr.msk.mxu1 %vm245_vm1, %v218_v7  ;;  %v216_v15 = vld [vmem:[%s2261_s6 + $0x20] sm:$0xff]  ;;  %vm977_vm0 = vcmask 392192   ;;  %s2284_s6 = sld [smem:[#allocation13_spill]] }
  0x30   :  { %1483 = vmatpush3.msk.msra.mxu1 %vm245_vm1, %v218_v7  ;;  %1484 = vmatprep.mubr.msk.f32.mxu1 %vm226_vm2, %v212_v9  ;;  %v1312_v30 = vld [vmem:[%s2264_s9] ss:$0 sm:$0xff]  ;;  %s1839_s9 = smov [#allocation9]  }
  0x31   :  { %v1315_v35 = vld [vmem:[%s2266_s11] ss:$0 sm:$0xff]  ;;  %s1299_s11 = sshll.u32 %s1839_s9, 4  ;;  %s1300_s11 = int_to_ptr.vmem [resolvable:$true] %s1299_s11 }
  0x32   :  { %v397_v4 = vld [vmem:[%s2281_s22] sm:$0xff]  ;;  %v398_v6 = vld [vmem:[%s2281_s22 + $0x8] sm:$0xff]  ;;  %v399_v12 = vld [vmem:[%s2281_s22 + $0x10] sm:$0xff]  ;;  %s1805_s12 = scalar_lea.vmem %s1300_s11, 256  ;;  %p1810_p3 = scmp.lt.s32.totalorder %s1300_s11, %s1300_s11 }
  0x33   :  { %v439_v5 = vld [vmem:[%s2282_s24] sm:$0xff]  ;;  %404 = vperm.xlu0 %1727, %v397_v4   ;;  %v440_v8 = vld [vmem:[%s2282_s24 + $0x8] sm:$0xff]  ;;  %1485 = vmatmul.mubr.msk.f32.vlgmr.msra.gmra.mrb[2].mxu1 %vm226_vm2, %v213_v10  ;;  %v400_v13 = vld [vmem:[%s2281_s22 + $0x18] sm:$0xff]  ;;  %p1806_p2 = scmp.ne.s32.totalorder %s1300_s11, %s1805_s12  ;;  %p1811_p4 = scmp.lt.s32.totalorder %s1805_s12, %s1805_s12 }
  0x34   :  { %446 = vperm.xlu1 %1728, %v439_v5   ;;  %1487 = vmatprep.mubr.msk.f32.mxu1 %vm226_vm2, %v214_v11  ;;  %v441_v16 = vld [vmem:[%s2282_s24 + $0x10] sm:$0xff]  ;;  %v442_v17 = vld [vmem:[%s2282_s24 + $0x18] sm:$0xff]  ;;  %v401_v19 = vld [vmem:[%s2281_s22 + $0x20] sm:$0xff] }
  0x35   :  { %v402_v20 = vld [vmem:[%s2281_s22 + $0x28] sm:$0xff]  ;;  %v443_v21 = vld [vmem:[%s2282_s24 + $0x20] sm:$0xff]  ;;  %s973_s22 = sadd.f32 1.0, %s2284_s6  ;;  %p1812_p5 = por %p1811_p4, %p1810_p3 }
  0x36   :  { %v444_v22 = vld [vmem:[%s2282_s24 + $0x28] sm:$0xff] }
  0x37   :  { %407 = vperm.xlu0 %1727, %v398_v6   ;;  %1488 = vmatmul.mubr.msk.f32.gmra.mrb[4].mxu1 %vm226_vm2, %v215_v14  ;;  %p1813_p6 = pnand %p1812_p5, %p1806_p2 }
  0x38   :  { %449 = vperm.xlu1 %1728, %v440_v8   ;;  %1490 = vmatprep.mubr.msk.f32.mxu1 %vm226_vm2, %v216_v15 }
  0x3b   :  { %410 = vperm.xlu0 %1727, %v399_v12   ;;  %1491 = vmatmul.mubr.msk.f32.gmra.mrb[6].mxu1 %vm226_vm2, %v217_v18 }
  0x3c   :  { %413 = vperm.xlu1 %1728, %v400_v13  }
  0x3f   :  { %452 = vperm.xlu0 %1727, %v441_v16  }
  0x40   :  { %455 = vperm.xlu1 %1728, %v442_v17  }
  0x43   :  { %416 = vperm.xlu0 %1727, %v401_v19  }
  0x44   :  { %419 = vperm.xlu1 %1728, %v402_v20  }
  0x47   :  { %458 = vperm.xlu0 %1727, %v443_v21  }
  0x48   :  { %461 = vperm.xlu1 %1728, %v444_v22  }
  0xb2   :  { %v405_v25 = vpop.permute.xlu0 %404 }
  0xb3   :  { %vm421_vm3 = vcmp.eq.s32.totalorder %v2043_v24, %v405_v25  ;;  %v447_v26 = vpop.permute.xlu1 %446 }
  0xb4   :  { %vm463_vm4 = vcmp.eq.s32.totalorder %v2043_v24, %v447_v26  ;;  %v1323_v28 = vsel %vm421_vm3, 1.0, %v1838_v27 }
  0xb5   :  { %v1329_v29 = vsel %vm463_vm4, 1.0, %v1838_v27  ;;  %1510 = vmatprep.mubr.msk.f32.mxu1 %vm481_vm5, %v1323_v28 }
  0xb6   :  { %1497 = vmatprep.mubr.msk.f32.mxu0 %vm481_vm5, %v1329_v29  ;;  %v408_v22 = vpop.permute.xlu0 %407 }
  0xb7   :  { %vm422_vm6 = vcmp.eq.s32.totalorder %v2043_v24, %v408_v22 }
 0x102   :  { %v1481_v31 = vpop.f32.mrb[0].mxu1 }
 0x103   :  { %v182_v32 = vadd.f32 %v1481_v31, %v1312_v30  ;;  %v176_v33 = vpop.f32.mrb[1].mxu1 }
 0x104   :  { %v177_v34 = vadd.f32 %v1312_v30, %v176_v33 }
 0x106   :  { %v185_v36 = vadd.f32 %v182_v32, %v177_v34  ;;  %v1486_v37 = vpop.f32.mrb[2].mxu1 }
 0x107   :  { %v321_v38 = vadd.f32 %v1486_v37, %v1315_v35  ;;  %v315_v39 = vpop.f32.mrb[3].mxu1 }
 0x108   :  { %v186_v40 = vrot.slane %v185_v36, 4  ;;  %v316_v41 = vadd.f32 %v1315_v35, %v315_v39 }
 0x10a   :  { %v187_v42 = vadd.f32 %v186_v40, %v185_v36  ;;  %v344_v43 = vadd.f32 %v321_v38, %v316_v41  ;;  %v1489_v44 = vpop.f32.mrb[4].mxu1 }
 0x10b   :  { %v325_v45 = vpop.f32.mrb[5].mxu1  ;;  %v331_v47 = vadd.f32 %v1489_v44, %v1315_v35 }
 0x10c   :  { %v188_v46 = vrot.slane %v187_v42, 2  ;;  %v326_v48 = vadd.f32 %v1315_v35, %v325_v45 }
 0x10e   :  { %v189_v49 = vadd.f32 %v188_v46, %v187_v42  ;;  %v345_v50 = vadd.f32 %v344_v43, %v326_v48  ;;  %v1492_v51 = vpop.f32.mrb[6].mxu1 }
 0x10f   :  { %v335_v52 = vpop.f32.mrb[7].mxu1  ;;  %v341_v54 = vadd.f32 %v1492_v51, %v1315_v35 }
 0x110   :  { %v190_v53 = vrot.slane %v189_v49, 1  ;;  %v336_v55 = vadd.f32 %v1315_v35, %v335_v52  ;;  %v346_v56 = vadd.f32 %v345_v50, %v331_v47  ;;  %v411_v35 = vpop.permute.xlu0 %410  ;;  %v725_v50 = vld [vmem:[#allocation4 + $0x88] sm:$0xff] }
 0x111   :  { %vm423_vm8 = vcmp.eq.s32.totalorder %v2043_v24, %v411_v35 }
 0x112   :  { %v191_v57 = vadd.f32 %v190_v53, %v189_v49  ;;  %v347_v58 = vadd.f32 %v346_v56, %v336_v55  ;;  %v724_v49 = vld [vmem:[#allocation4 + $0x80] sm:$0xff] }
 0x113   :  { %v1612_v56 = vpack.c.bf16 %v725_v50, %v724_v49 }
 0x114   :  { %v193_v59 = vmul.f32 0.0625, %v191_v57  ;;  %v348_v60 = vadd.f32 %v347_v58, %v341_v54 }
 0x116   :  { %v194_v61 = vsub.f32 %v177_v34, %v193_v59  ;;  %v195_v62 = vsub.f32 %v182_v32, %v193_v59  ;;  %v349_v63 = vrot.slane %v348_v60, 4  ;;  %v450_v32 = vpop.permute.xlu1 %449  ;;  %v708_v59 = vld [vmem:[#allocation4] sm:$0xff] }
 0x117   :  { %vm464_vm7 = vcmp.eq.s32.totalorder %v2043_v24, %v450_v32  ;;  %v731_v32 = vld [vmem:[#allocation4 + $0xb8] sm:$0xff] }
 0x118   :  { %v196_v0 = vmul.f32 %v194_v61, %v194_v61  ;;  %v197_v1 = vmul.f32 %v195_v62, %v195_v62  ;;  %v350_v2 = vadd.f32 %v349_v63, %v348_v60  ;;  %v709_v60 = vld [vmem:[#allocation4 + $0x8] sm:$0xff] }
 0x11a   :  { %v198_v3 = vadd.f32 %v197_v1, %v196_v0  ;;  %v351_v4 = vrot.slane %v350_v2, 2  ;;  %v414_v39 = vpop.permute.xlu1 %413  ;;  %v1614_v1 = vpack.c.bf16 %v709_v60, %v708_v59 }
 0x11b   :  { %vm424_vm10 = vcmp.eq.s32.totalorder %v2043_v24, %v414_v39  ;;  %v733_v39 = vld [vmem:[#allocation4 + $0xc8] sm:$0xff] }
 0x11c   :  { %v199_v5 = vrot.slane %v198_v3, 4  ;;  %v352_v6 = vadd.f32 %v351_v4, %v350_v2  ;;  %v1330_v4 = vsel %vm464_vm7, 1.0, %v1838_v27 }
 0x11e   :  { %v200_v7 = vadd.f32 %v199_v5, %v198_v3  ;;  %v353_v8 = vrot.slane %v352_v6, 1  ;;  %v456_v45 = vpop.permute.xlu1 %455  ;;  %v1324_v3 = vsel %vm422_vm6, 1.0, %v1838_v27  ;;  %v1325_v5 = vsel %vm423_vm8, 1.0, %v1838_v27 }
 0x11f   :  { %vm466_vm11 = vcmp.eq.s32.totalorder %v2043_v24, %v456_v45  ;;  %v734_v45 = vld [vmem:[#allocation4 + $0xd0] sm:$0xff] }
 0x120   :  { %v201_v9 = vrot.slane %v200_v7, 2  ;;  %v354_v10 = vadd.f32 %v353_v8, %v352_v6  ;;  %v711_v8 = vld [vmem:[#allocation4 + $0x18] sm:$0xff]  ;;  %v1332_v22 = vsel %vm466_vm11, 1.0, %v1838_v27 }
 0x122   :  { %v202_v11 = vadd.f32 %v201_v9, %v200_v7  ;;  %v356_v12 = vmul.f32 0.020833334, %v354_v10  ;;  %v420_v58 = vpop.permute.xlu1 %419  ;;  %v710_v7 = vld [vmem:[#allocation4 + $0x10] sm:$0xff]  ;;  %v728_v10 = vld [vmem:[#allocation4 + $0xa0] sm:$0xff] }
 0x123   :  { %vm426_vm14 = vcmp.eq.s32.totalorder %v2043_v24, %v420_v58  ;;  %v737_v58 = vld [vmem:[#allocation4 + $0xe8] sm:$0xff] }
 0x124   :  { %v203_v13 = vrot.slane %v202_v11, 1  ;;  %v2057_v14 = vsub.f32 %v331_v47, %v356_v12  ;;  %v2059_v15 = vsub.f32 %v336_v55, %v356_v12  ;;  %v2061_v16 = vsub.f32 %v316_v41, %v356_v12  ;;  %v453_v41 = vpop.permute.xlu0 %452 }
 0x125   :  { %v2063_v17 = vsub.f32 %v321_v38, %v356_v12  ;;  %v2065_v18 = vsub.f32 %v326_v48, %v356_v12  ;;  %v2067_v19 = vsub.f32 %v341_v54, %v356_v12  ;;  %vm465_vm9 = vcmp.eq.s32.totalorder %v2043_v24, %v453_v41 }
 0x126   :  { %v204_v20 = vadd.f32 %v203_v13, %v202_v11  ;;  %v363_v21 = vmul.f32 %v2061_v16, %v2061_v16  ;;  %v366_v29 = vmul.f32 %v2057_v14, %v2057_v14  ;;  %v367_v33 = vmul.f32 %v2059_v15, %v2059_v15  ;;  %v729_v11 = vld [vmem:[#allocation4 + $0xa8] sm:$0xff]  ;;  %v462_v13 = vpop.permute.xlu1 %461 }
 0x127   :  { %v364_v25 = vmul.f32 %v2063_v17, %v2063_v17  ;;  %v365_v26 = vmul.f32 %v2065_v18, %v2065_v18  ;;  %v368_v36 = vmul.f32 %v2067_v19, %v2067_v19  ;;  %v1331_v9 = vsel %vm465_vm9, 1.0, %v1838_v27 }
 0x128   :  { %v205_v28 = vmul.f32 0.0625, %v204_v20  ;;  %v417_v53 = vpop.permute.xlu0 %416  ;;  %v1618_v20 = vpack.c.bf16 %v711_v8, %v710_v7  ;;  %vm468_vm15 = vcmp.eq.s32.totalorder %v2043_v24, %v462_v13 }
 0x129   :  { %v369_v30 = vadd.f32 %v364_v25, %v363_v21  ;;  %vm425_vm12 = vcmp.eq.s32.totalorder %v2043_v24, %v417_v53  ;;  %v1326_v21 = vsel %vm424_vm10, 1.0, %v1838_v27  ;;  %v1620_v25 = vpack.c.bf16 %v729_v11, %v728_v10 }
 0x12a   :  { %v206_v31 = vadd.f32 1e-05, %v205_v28  ;;  %v713_v28 = vld [vmem:[#allocation4 + $0x28] sm:$0xff]  ;;  %v1334_v35 = vsel %vm468_vm15, 1.0, %v1838_v27 }
 0x12b   :  { %v370_v34 = vadd.f32 %v369_v30, %v365_v26  ;;  %v712_v26 = vld [vmem:[#allocation4 + $0x20] sm:$0xff] }
 0x12c   :  { %1729 = vrsqrt.f32 %v206_v31  ;;  %v459_v0 = vpop.permute.xlu0 %458  ;;  %v730_v31 = vld [vmem:[#allocation4 + $0xb0] sm:$0xff] }
 0x12d   :  { %v371_v37 = vadd.f32 %v370_v34, %v366_v29  ;;  %vm467_vm13 = vcmp.eq.s32.totalorder %v2043_v24, %v459_v0  ;;  %v1327_v29 = vsel %vm425_vm12, 1.0, %v1838_v27  ;;  %v1328_v34 = vsel %vm426_vm14, 1.0, %v1838_v27  ;;  %v715_v24 = vld [vmem:[#allocation4 + $0x38] sm:$0xff] }
 0x12e   :  { %v1333_v30 = vsel %vm467_vm13, 1.0, %v1838_v27 }
 0x12f   :  { %v372_v38 = vadd.f32 %v371_v37, %v367_v33  ;;  %v1622_v33 = vpack.c.bf16 %v713_v28, %v712_v26  ;;  %v714_v37 = vld [vmem:[#allocation4 + $0x30] sm:$0xff] }
 0x131   :  { %v373_v40 = vadd.f32 %v372_v38, %v368_v36  ;;  %v1624_v36 = vpack.c.bf16 %v731_v32, %v730_v31  ;;  %v732_v38 = vld [vmem:[#allocation4 + $0xc0] sm:$0xff] }
 0x132   :  { %v1628_v41 = vpack.c.bf16 %v733_v39, %v732_v38 }
 0x133   :  { %v374_v42 = vrot.slane %v373_v40, 4 }
 0x135   :  { %v375_v43 = vadd.f32 %v374_v42, %v373_v40  ;;  %v1626_v40 = vpack.c.bf16 %v715_v24, %v714_v37  ;;  %v716_v42 = vld [vmem:[#allocation4 + $0x40] sm:$0xff] }
 0x136   :  { %v1730_v44 = vpop.eup %1729 }
 0x137   :  { %v2081_v46 = vmul.f32 %v1730_v44, %v194_v61  ;;  %v2083_v47 = vmul.f32 %v1730_v44, %v195_v62  ;;  %v376_v48 = vrot.slane %v375_v43, 2  ;;  %v726_v61 = vld [vmem:[#allocation4 + $0x90] sm:$0xff]  ;;  %v727_v62 = vld [vmem:[#allocation4 + $0x98] sm:$0xff] }
 0x138   :  { %v1616_v6 = vpack.c.bf16 %v727_v62, %v726_v61  ;;  %v720_v61 = vld [vmem:[#allocation4 + $0x60] sm:$0xff]  ;;  %v721_v62 = vld [vmem:[#allocation4 + $0x68] sm:$0xff] }
 0x139   :  { %v210_v51 = vmax.f32 %v2081_v46, 0.0  ;;  %v211_v52 = vmax.f32 %v2083_v47, 0.0  ;;  %v377_v54 = vadd.f32 %v376_v48, %v375_v43  ;;  %v717_v43 = vld [vmem:[#allocation4 + $0x48] sm:$0xff]  ;;  %v735_v48 = vld [vmem:[#allocation4 + $0xd8] sm:$0xff]  ;;  %v1638_v0 = vpack.c.bf16 %v721_v62, %v720_v61  ;;  %v1348_v62 = vld [vmem:[%s2269_s14] ss:$0 sm:$0xff] }
 0x13a   :  { %v1630_v50 = vpack.c.bf16 %v717_v43, %v716_v42  ;;  %v1632_v53 = vpack.c.bf16 %v735_v48, %v734_v45  ;;  %v1347_v43 = vld [vmem:[%s2268_s13] ss:$0 sm:$0xff]  ;;  %v1196_v47 = vld [vmem:[#allocation7 + $0x10] sm:$0xff] }
 0x13b   :  { %v1604_v55 = vpack.c.bf16 %v211_v52, %v210_v51  ;;  %v378_v57 = vrot.slane %v377_v54, 1 }
 0x13d   :  { %1605 = vmatprep.subr.bf16.mxu0 %v1604_v55  ;;  %1609 = vmatprep.subr.bf16.mxu1 %v1604_v55  ;;  %v379_v63 = vadd.f32 %v378_v57, %v377_v54  ;;  %v718_v54 = vld [vmem:[#allocation4 + $0x50] sm:$0xff]  ;;  %v736_v57 = vld [vmem:[#allocation4 + $0xe0] sm:$0xff] }
 0x13e   :  { %1607 = vmatpush3.bf16.msra.mxu0 %v1604_v55  ;;  %1611 = vmatpush3.bf16.msra.mxu1 %v1604_v55  ;;  %v719_v55 = vld [vmem:[#allocation4 + $0x58] sm:$0xff]  ;;  %v1636_v60 = vpack.c.bf16 %v737_v58, %v736_v57 }
 0x13f   :  { %1613 = vmatprep.subr.bf16.mxu0 %v1612_v56  ;;  %v380_v2 = vmul.f32 0.020833334, %v379_v63  ;;  %v1634_v59 = vpack.c.bf16 %v719_v55, %v718_v54 }
 0x141   :  { %1498 = vmatmul.mubr.msk.f32.vlgmr.msra.gmra.mrb[0].mxu0 %vm481_vm5, %v1330_v4  ;;  %1511 = vmatmul.mubr.msk.f32.vlgmr.msra.gmra.mrb[8].mxu1 %vm481_vm5, %v1324_v3  ;;  %v381_v12 = vadd.f32 1e-05, %v380_v2  ;;  %v739_v3 = vld [vmem:[#allocation4 + $0xf8] sm:$0xff] }
 0x142   :  { %1500 = vmatprep.mubr.msk.f32.mxu0 %vm481_vm5, %v1331_v9  ;;  %1513 = vmatprep.mubr.msk.f32.mxu1 %vm481_vm5, %v1325_v5  ;;  %v722_v5 = vld [vmem:[#allocation4 + $0x70] sm:$0xff] }
 0x143   :  { %1615 = vmatpush3.bf16.msra.mxu0 %v1614_v1  ;;  %1731 = vrsqrt.f32 %v381_v12 }
 0x144   :  { %1617 = vmatprep.subr.bf16.mxu0 %v1616_v6  ;;  %v723_v6 = vld [vmem:[#allocation4 + $0x78] sm:$0xff] }
 0x145   :  { %1501 = vmatmul.mubr.msk.f32.gmra.mrb[2].mxu0 %vm481_vm5, %v1332_v22  ;;  %1514 = vmatmul.mubr.msk.f32.gmra.mrb[10].mxu1 %vm481_vm5, %v1326_v21  ;;  %v1642_v7 = vpack.c.bf16 %v723_v6, %v722_v5 }
 0x146   :  { %1503 = vmatprep.mubr.msk.f32.mxu0 %vm481_vm5, %v1333_v30  ;;  %1516 = vmatprep.mubr.msk.f32.mxu1 %vm481_vm5, %v1327_v29 }
 0x147   :  { %1619 = vmatpush3.bf16.msra.mxu0 %v1618_v20 }
 0x148   :  { %1621 = vmatprep.subr.bf16.mxu0 %v1620_v25 }
 0x149   :  { %1504 = vmatmul.mubr.msk.f32.gmra.mrb[4].mxu0 %vm481_vm5, %v1334_v35  ;;  %1517 = vmatmul.mubr.msk.f32.gmra.mrb[12].mxu1 %vm481_vm5, %v1328_v34 }
 0x14b   :  { %1623 = vmatpush3.bf16.msra.mxu0 %v1622_v33 }
 0x14c   :  { %1625 = vmatprep.subr.bf16.mxu0 %v1624_v36 }
 0x14d   :  { %v1732_v44 = vpop.eup %1731 }
 0x14e   :  { %v384_v49 = vmul.f32 %v1732_v44, %v2063_v17  ;;  %v383_v56 = vmul.f32 %v1732_v44, %v2061_v16  ;;  %v386_v63 = vmul.f32 %v1732_v44, %v2057_v14  ;;  %v385_v17 = vmul.f32 %v1732_v44, %v2065_v18  ;;  %v738_v16 = vld [vmem:[#allocation4 + $0xf0] sm:$0xff] }
 0x14f   :  { %1627 = vmatpush3.bf16.msra.mxu0 %v1626_v40  ;;  %v388_v1 = vmul.f32 %v1732_v44, %v2067_v19  ;;  %v387_v2 = vmul.f32 %v1732_v44, %v2059_v15  ;;  %v1640_v4 = vpack.c.bf16 %v739_v3, %v738_v16 }
 0x150   :  { %1629 = vmatprep.subr.bf16.mxu0 %v1628_v41  ;;  %v390_v8 = vmax.f32 %v384_v49, 0.0  ;;  %v389_v18 = vmax.f32 %v383_v56, 0.0  ;;  %v392_v20 = vmax.f32 %v386_v63, 0.0  ;;  %v391_v25 = vmax.f32 %v385_v17, 0.0 }
 0x151   :  { %v394_v33 = vmax.f32 %v388_v1, 0.0  ;;  %v393_v36 = vmax.f32 %v387_v2, 0.0 }
 0x153   :  { %1631 = vmatpush3.bf16.msra.mxu0 %v1630_v50 }
 0x154   :  { %1633 = vmatprep.subr.bf16.mxu0 %v1632_v53 }
 0x157   :  { %1635 = vmatpush3.bf16.msra.mxu0 %v1634_v59 }
 0x158   :  { %1637 = vmatprep.subr.bf16.mxu0 %v1636_v60 }
 0x15b   :  { %1639 = vmatpush3.bf16.msra.mxu0 %v1638_v0 }
 0x15c   :  { %1641 = vmatprep.subr.bf16.mxu0 %v1640_v4 }
 0x15f   :  { %1643 = vmatpush3.bf16.msra.mxu0 %v1642_v7 }
 0x214   :  { %v1499_v14 = vpop.f32.mrb[0].mxu0  ;;  %v1512_v9 = vpop.f32.mrb[8].mxu1 }
 0x215   :  { %v2131_v10 = vadd.f32 %v1499_v14, %v390_v8  ;;  %v685_v11 = vadd.f32 %v1512_v9, %v390_v8  ;;  %v566_v12 = vpop.f32.mrb[1].mxu0  ;;  %v679_v19 = vpop.f32.mrb[9].mxu1 }
 0x216   :  { %v2133_v13 = vadd.f32 %v566_v12, %v389_v18  ;;  %v680_v15 = vadd.f32 %v679_v19, %v389_v18  ;;  %811 = vmatprep.mubr.f32.mxu0 %v566_v12 }
 0x218   :  { %v1502_v21 = vpop.f32.mrb[2].mxu0  ;;  %v1515_v22 = vpop.f32.mrb[10].mxu1  ;;  %812 = vmatmul.mubr.f32.vlgmr.msra.gmra.mrb[6].mxu0 %v680_v15 }
 0x219   :  { %v2135_v26 = vadd.f32 %v1502_v21, %v392_v20  ;;  %v695_v28 = vadd.f32 %v1515_v22, %v392_v20  ;;  %v576_v29 = vpop.f32.mrb[3].mxu0  ;;  %v689_v30 = vpop.f32.mrb[11].mxu1  ;;  %816 = vmatprep.mubr.f32.mxu0 %v1499_v14  ;;  %v959_v22 = vshrl.u32 %v395_v23, 7  ;;  %v874_v23 = vstv %s2283_s29 }
 0x21a   :  { %v2137_v31 = vadd.f32 %v576_v29, %v391_v25  ;;  %v690_v32 = vadd.f32 %v689_v30, %v391_v25  ;;  %v2153_v25 = vld [vmem:[%s2259_s4] ss:$0 sm:$0xff] }
 0x21b   :  { %vm966_vm1 = vcmp.eq.s32.totalorder %v959_v22, %v2153_v25 }
 0x21c   :  { %v1505_v34 = vpop.f32.mrb[4].mxu0  ;;  %v1518_v35 = vpop.f32.mrb[12].mxu1  ;;  %817 = vmatmul.mubr.f32.gmra.mrb[8].mxu0 %v685_v11 }
 0x21d   :  { %v2139_v37 = vadd.f32 %v1505_v34, %v394_v33  ;;  %v705_v24 = vadd.f32 %v1518_v35, %v394_v33  ;;  %v586_v38 = vpop.f32.mrb[5].mxu0  ;;  %v699_v39 = vpop.f32.mrb[13].mxu1  ;;  %821 = vmatprep.mubr.f32.mxu0 %v576_v29  ;;  %v1350_v29 = vsel %vm966_vm1, 1.0, %v1838_v27 }
 0x21e   :  { %v2141_v40 = vadd.f32 %v586_v38, %v393_v36  ;;  %v700_v41 = vadd.f32 %v699_v39, %v393_v36  ;;  %1531 = vmatprep.mubr.msk.f32.mxu1 %vm977_vm0, %v1350_v29 }
 0x220   :  { %822 = vmatmul.mubr.f32.gmra.mrb[10].mxu0 %v690_v32 }
 0x221   :  { %826 = vmatprep.mubr.f32.mxu0 %v1502_v21 }
 0x224   :  { %827 = vmatmul.mubr.f32.gmra.mrb[12].mxu0 %v695_v28  ;;  %v2155_v28 = vadd.s32 8, %v959_v22 }
 0x225   :  { %831 = vmatprep.mubr.f32.mxu0 %v586_v38 }
 0x226   :  { %vm967_vm2 = vcmp.eq.s32.totalorder %v2155_v28, %v2153_v25  ;;  %v1076_v25 = vld [vmem:[%s2270_s15 + $0x30] sm:$0xff] }
 0x228   :  { %832 = vmatmul.mubr.f32.gmra.mrb[14].mxu0 %v700_v41 }
 0x229   :  { %836 = vmatprep.mubr.f32.mxu0 %v1505_v34 }
 0x22c   :  { %837 = vmatmul.mubr.f32.gmra.mrb[16].mxu0 %v705_v24 }
 0x2eb   :  { %v1415_v42 = vpop.f32.mrb[6].mxu0 }
 0x2ec   :  { %v1416_v44 = vpop.f32.mrb[7].mxu0 }
 0x2ed   :  { %v1417_v45 = vadd.f32 %v1416_v44, %v1415_v42 }
 0x2ef   :  { %v814_v48 = vadd.f32 %v1417_v45, %v1347_v43  ;;  %v1418_v49 = vpop.f32.mrb[8].mxu0 }
 0x2f0   :  { %v1419_v50 = vpop.f32.mrb[9].mxu0 }
 0x2f1   :  { %1733 = vtanh.f32 %v814_v48  ;;  %v1420_v53 = vadd.f32 %v1419_v50, %v1418_v49 }
 0x2f3   :  { %v819_v54 = vadd.f32 %v1420_v53, %v1347_v43  ;;  %v1421_v55 = vpop.f32.mrb[10].mxu0 }
 0x2f4   :  { %v1422_v56 = vpop.f32.mrb[11].mxu0 }
 0x2f5   :  { %1735 = vtanh.f32 %v819_v54  ;;  %v1423_v57 = vadd.f32 %v1422_v56, %v1421_v55 }
 0x2f7   :  { %v824_v58 = vadd.f32 %v1423_v57, %v1347_v43  ;;  %v1424_v59 = vpop.f32.mrb[12].mxu0 }
 0x2f8   :  { %v1425_v60 = vpop.f32.mrb[13].mxu0 }
 0x2f9   :  { %1737 = vtanh.f32 %v824_v58  ;;  %v1426_v61 = vadd.f32 %v1425_v60, %v1424_v59 }
 0x2fb   :  { %v1734_v63 = vpop.eup %1733  ;;  %v1427_v17 = vpop.f32.mrb[14].mxu0  ;;  %v829_v14 = vadd.f32 %v1426_v61, %v1347_v43 }
 0x2fc   :  { %v1428_v0 = vpop.f32.mrb[15].mxu0  ;;  %v855_v1 = vmul.f32 %v1734_v63, %v1348_v62 }
 0x2fd   :  { %v1429_v2 = vadd.f32 %v1428_v0, %v1427_v17 }
 0x2fe   :  { %861 = vadd.xlane.f32.xlu0 %v855_v1 }
 0x2ff   :  { %v1736_v16 = vpop.eup %1735  ;;  %v834_v3 = vadd.f32 %v1429_v2, %v1347_v43  ;;  %v1430_v4 = vpop.f32.mrb[16].mxu0 }
 0x300   :  { %v1431_v5 = vpop.f32.mrb[17].mxu0  ;;  %v856_v6 = vmul.f32 %v1736_v16, %v1348_v62 }
 0x301   :  { %1739 = vtanh.f32 %v834_v3  ;;  %v1432_v7 = vadd.f32 %v1431_v5, %v1430_v4 }
 0x302   :  { %863 = vadd.xlane.f32.xlu1 %v856_v6 }
 0x303   :  { %v1738_v8 = vpop.eup %1737  ;;  %v839_v9 = vadd.f32 %v1432_v7, %v1347_v43 }
 0x304   :  { %v857_v18 = vmul.f32 %v1738_v8, %v1348_v62 }
 0x305   :  { %1741 = vtanh.f32 %v839_v9 }
 0x306   :  { %865 = vadd.xlane.f32.xlu1 %v857_v18  ;;  %1743 = vtanh.f32 %v829_v14 }
 0x30b   :  { %v1740_v11 = vpop.eup %1739 }
 0x30c   :  { %v859_v12 = vmul.f32 %v1740_v11, %v1348_v62 }
 0x30e   :  { %869 = vadd.xlane.f32.xlu0 %v859_v12 }
 0x30f   :  { %v1742_v19 = vpop.eup %1741 }
 0x310   :  { %v860_v15 = vmul.f32 %v1742_v19, %v1348_v62  ;;  %v1744_v20 = vpop.eup %1743 }
 0x311   :  { %v858_v21 = vmul.f32 %v1744_v20, %v1348_v62 }
 0x312   :  { %871 = vadd.xlane.f32.xlu0 %v860_v15 }
 0x316   :  { %867 = vadd.xlane.f32.xlu0 %v858_v21 }
 0x38b   :  { %v862_v30 = vpop.xlane.xlu0 %861 }
 0x38c   :  { %v875_v24 = vadd.f32 %v874_v23, %v862_v30 }
 0x38e   :  { %v887_v44 = vmul.f32 0.2, %v875_v24  ;;  %vm881_vm6 = vcmp.gt.f32.partialorder %v875_v24, 0.0 }
 0x38f   :  { %v864_v32 = vpop.xlane.xlu1 %863 }
 0x390   :  { %v876_v33 = vadd.f32 %v874_v23, %v864_v32  ;;  %v893_v57 = vsel %vm881_vm6, %v875_v24, %v887_v44 }
 0x392   :  { %v888_v38 = vmul.f32 0.2, %v876_v33  ;;  %vm882_vm3 = vcmp.gt.f32.partialorder %v876_v33, 0.0 }
 0x393   :  { %v866_v36 = vpop.xlane.xlu1 %865 }
 0x394   :  { %v877_v41 = vadd.f32 %v874_v23, %v866_v36  ;;  %v894_v48 = vsel %vm882_vm3, %v876_v33, %v888_v38 }
 0x396   :  { %v889_v50 = vmul.f32 0.2, %v877_v41  ;;  %vm883_vm7 = vcmp.gt.f32.partialorder %v877_v41, 0.0 }
 0x398   :  { %v895_v60 = vsel %vm883_vm7, %v877_v41, %v889_v50 }
 0x39b   :  { %v870_v34 = vpop.xlane.xlu0 %869 }
 0x39c   :  { %v879_v35 = vadd.f32 %v874_v23, %v870_v34 }
 0x39e   :  { %v891_v42 = vmul.f32 0.2, %v879_v35  ;;  %vm885_vm4 = vcmp.gt.f32.partialorder %v879_v35, 0.0 }
 0x39f   :  { %v872_v39 = vpop.xlane.xlu0 %871 }
 0x3a0   :  { %v880_v43 = vadd.f32 %v874_v23, %v872_v39  ;;  %v897_v53 = vsel %vm885_vm4, %v879_v35, %v891_v42 }
 0x3a1   :  { %v899_v59 = vmax.f32 %v893_v57, %v897_v53 }
 0x3a2   :  { %vm886_vm5 = vcmp.gt.f32.partialorder %v880_v43, 0.0  ;;  %v892_v45 = vmul.f32 0.2, %v880_v43 }
 0x3a3   :  { %v868_v49 = vpop.xlane.xlu0 %867 }
 0x3a4   :  { %v898_v54 = vsel %vm886_vm5, %v880_v43, %v892_v45  ;;  %v878_v55 = vadd.f32 %v874_v23, %v868_v49 }
 0x3a5   :  { %v900_v56 = vmax.f32 %v894_v48, %v898_v54 }
 0x3a6   :  { %vm884_vm8 = vcmp.gt.f32.partialorder %v878_v55, 0.0  ;;  %v890_v58 = vmul.f32 0.2, %v878_v55 }
 0x3a7   :  { %v901_v62 = vmax.f32 %v899_v59, %v900_v56 }
 0x3a8   :  { %v896_v61 = vsel %vm884_vm8, %v878_v55, %v890_v58 }
 0x3a9   :  { %v902_v63 = vmax.f32 %v895_v60, %v896_v61 }
 0x3ab   :  { %v903_v17 = vmax.f32 %v901_v62, %v902_v63 }
 0x3ad   :  { %v904_v0 = vrot.slane %v903_v17, 4 }
 0x3af   :  { %v905_v1 = vmax.f32 %v903_v17, %v904_v0 }
 0x3b1   :  { %v906_v2 = vrot.slane %v905_v1, 2 }
 0x3b3   :  { %v907_v16 = vmax.f32 %v905_v1, %v906_v2  ;;  %v1074_v1 = vld [vmem:[%s2270_s15 + $0x20] sm:$0xff]  ;;  %v1075_v2 = vld [vmem:[%s2270_s15 + $0x28] sm:$0xff] }
 0x3b5   :  { %v908_v3 = vrot.slane %v907_v16, 1 }
 0x3b7   :  { %v909_v4 = vmax.f32 %v907_v16, %v908_v3  ;;  %v1664_v16 = vpack.c.bf16 %v1075_v2, %v1074_v1  ;;  %v1078_v3 = vld [vmem:[%s2270_s15 + $0x40] sm:$0xff] }
 0x3b9   :  { %v910_v5 = vsub.f32 %v893_v57, %v909_v4  ;;  %v911_v6 = vsub.f32 %v894_v48, %v909_v4  ;;  %v912_v7 = vsub.f32 %v895_v60, %v909_v4  ;;  %v913_v8 = vsub.f32 %v896_v61, %v909_v4 }
 0x3ba   :  { %v914_v18 = vsub.f32 %v897_v53, %v909_v4  ;;  %v915_v12 = vsub.f32 %v898_v54, %v909_v4  ;;  %v1079_v4 = vld [vmem:[%s2270_s15 + $0x48] sm:$0xff] }
 0x3bb   :  { %v916_v14 = vmul.f32 1.442695, %v910_v5  ;;  %v918_v9 = vmul.f32 1.442695, %v911_v6  ;;  %v920_v11 = vmul.f32 1.442695, %v912_v7  ;;  %v1672_v5 = vpack.c.bf16 %v1079_v4, %v1078_v3 }
 0x3bc   :  { %v922_v19 = vmul.f32 1.442695, %v913_v8  ;;  %v924_v15 = vmul.f32 1.442695, %v914_v18  ;;  %v926_v20 = vmul.f32 1.442695, %v915_v12 }
 0x3bd   :  { %1745 = vpow2.f32 %v916_v14  ;;  %v1080_v6 = vld [vmem:[%s2270_s15 + $0x50] sm:$0xff]  ;;  %v1081_v7 = vld [vmem:[%s2270_s15 + $0x58] sm:$0xff]  ;;  %v1082_v14 = vld [vmem:[%s2270_s15 + $0x60] sm:$0xff] }
 0x3be   :  { %1747 = vpow2.f32 %v918_v9  ;;  %v1676_v8 = vpack.c.bf16 %v1081_v7, %v1080_v6  ;;  %v1083_v9 = vld [vmem:[%s2270_s15 + $0x68] sm:$0xff]  ;;  %v1085_v12 = vld [vmem:[%s2270_s15 + $0x78] sm:$0xff] }
 0x3bf   :  { %1749 = vpow2.f32 %v920_v11  ;;  %v1680_v18 = vpack.c.bf16 %v1083_v9, %v1082_v14  ;;  %v1084_v11 = vld [vmem:[%s2270_s15 + $0x70] sm:$0xff] }
 0x3c0   :  { %1751 = vpow2.f32 %v922_v19  ;;  %v1684_v19 = vpack.c.bf16 %v1085_v12, %v1084_v11 }
 0x3c1   :  { %1753 = vpow2.f32 %v924_v15  ;;  %v974_v15 = vstv %s973_s22 }
 0x3c2   :  { %1755 = vpow2.f32 %v926_v20  ;;  %v976_v20 = vmul.f32 %v974_v15, %v211_v52  ;;  %v1197_v52 = vld [vmem:[#allocation7 + $0x18] sm:$0xff] }
 0x3c3   :  { %v1692_v46 = vpack.c.bf16 %v1197_v52, %v1196_v47 }
 0x3c7   :  { %v1746_v21 = vpop.eup %1745 }
 0x3c8   :  { %v1748_v22 = vpop.eup %1747 }
 0x3c9   :  { %v928_v29 = vadd.f32 %v1748_v22, %v1746_v21  ;;  %v1750_v30 = vpop.eup %1749 }
 0x3ca   :  { %v1752_v23 = vpop.eup %1751 }
 0x3cb   :  { %v929_v32 = vadd.f32 %v1750_v30, %v928_v29  ;;  %v1754_v34 = vpop.eup %1753 }
 0x3cc   :  { %v1756_v36 = vpop.eup %1755 }
 0x3cd   :  { %v930_v33 = vadd.f32 %v1752_v23, %v929_v32 }
 0x3cf   :  { %v931_v35 = vadd.f32 %v1754_v34, %v930_v33 }
 0x3d1   :  { %v932_v24 = vadd.f32 %v1756_v36, %v931_v35  ;;  %v1194_v35 = vld [vmem:[#allocation7] sm:$0xff] }
 0x3d3   :  { %v933_v38 = vrot.slane %v932_v24, 4 }
 0x3d5   :  { %v934_v39 = vadd.f32 %v933_v38, %v932_v24  ;;  %v1199_v38 = vld [vmem:[#allocation7 + $0x28] sm:$0xff] }
 0x3d7   :  { %v935_v41 = vrot.slane %v934_v39, 2 }
 0x3d9   :  { %v936_v42 = vadd.f32 %v935_v41, %v934_v39  ;;  %v1200_v41 = vld [vmem:[#allocation7 + $0x30] sm:$0xff] }
 0x3db   :  { %v937_v43 = vrot.slane %v936_v42, 1 }
 0x3dd   :  { %v938_v44 = vadd.f32 %v937_v43, %v936_v42  ;;  %v1201_v42 = vld [vmem:[#allocation7 + $0x38] sm:$0xff] }
 0x3de   :  { %v1700_v43 = vpack.c.bf16 %v1201_v42, %v1200_v41 }
 0x3df   :  { %1757 = vrcp.f32 %v938_v44  ;;  %v1202_v44 = vld [vmem:[#allocation7 + $0x40] sm:$0xff] }
 0x3e9   :  { %v1758_v45 = vpop.eup %1757 }
 0x3ea   :  { %v940_v48 = vmul.f32 %v1758_v45, %v1746_v21  ;;  %v941_v49 = vmul.f32 %v1758_v45, %v1748_v22  ;;  %v942_v50 = vmul.f32 %v1758_v45, %v1750_v30  ;;  %v943_v53 = vmul.f32 %v1758_v45, %v1752_v23  ;;  %v1354_v30 = vld [vmem:[%s2262_s7] ss:$0 sm:$0xff] }
 0x3eb   :  { %v944_v54 = vmul.f32 %v1758_v45, %v1754_v34  ;;  %v945_v55 = vmul.f32 %v1758_v45, %v1756_v36  ;;  %v975_v22 = vmul.f32 %v974_v15, %v210_v51  ;;  %v1195_v36 = vld [vmem:[#allocation7 + $0x8] sm:$0xff]  ;;  %v1198_v51 = vld [vmem:[#allocation7 + $0x20] sm:$0xff] }
 0x3ec   :  { %v952_v56 = vmul.f32 %v2133_v13, %v940_v48  ;;  %v953_v57 = vmul.f32 %v2131_v10, %v941_v49  ;;  %v954_v58 = vmul.f32 %v2137_v31, %v942_v50  ;;  %v955_v59 = vmul.f32 %v2135_v26, %v943_v53  ;;  %v1070_v13 = vld [vmem:[%s2270_s15] sm:$0xff]  ;;  %v1071_v10 = vld [vmem:[%s2270_s15 + $0x8] sm:$0xff]  ;;  %v1072_v31 = vld [vmem:[%s2270_s15 + $0x10] sm:$0xff] }
 0x3ed   :  { %v956_v60 = vmul.f32 %v2141_v40, %v944_v54  ;;  %v957_v61 = vmul.f32 %v2139_v37, %v945_v55  ;;  %v1656_v26 = vpack.c.bf16 %v1071_v10, %v1070_v13  ;;  %v1073_v37 = vld [vmem:[%s2270_s15 + $0x18] sm:$0xff]  ;;  %v1351_v40 = vsel %vm967_vm2, 1.0, %v1838_v27  ;;  %v1203_v45 = vld [vmem:[#allocation7 + $0x48] sm:$0xff]  ;;  %v1204_v49 = vld [vmem:[#allocation7 + $0x50] sm:$0xff] }
 0x3ee   :  { %v1644_v62 = vpack.c.bf16 %v953_v57, %v952_v56  ;;  %v1648_v63 = vpack.c.bf16 %v955_v59, %v954_v58  ;;  %v1660_v0 = vpack.c.bf16 %v1073_v37, %v1072_v31  ;;  %v1077_v27 = vld [vmem:[%s2270_s15 + $0x38] sm:$0xff]  ;;  %v1688_v24 = vpack.c.bf16 %v1195_v36, %v1194_v35  ;;  %v1206_v54 = vld [vmem:[#allocation7 + $0x60] sm:$0xff]  ;;  %v1207_v55 = vld [vmem:[#allocation7 + $0x68] sm:$0xff] }
 0x3ef   :  { %v1652_v17 = vpack.c.bf16 %v957_v61, %v956_v60  ;;  %v1668_v28 = vpack.c.bf16 %v1077_v27, %v1076_v25  ;;  %v1696_v39 = vpack.c.bf16 %v1199_v38, %v1198_v51  ;;  %v1704_v48 = vpack.c.bf16 %v1203_v45, %v1202_v44  ;;  %v1205_v50 = vld [vmem:[#allocation7 + $0x58] sm:$0xff]  ;;  %v1208_v57 = vld [vmem:[#allocation7 + $0x70] sm:$0xff]  ;;  %v1355_v60 = vld [vmem:[%s2271_s16] ss:$0 sm:$0xff] }
 0x3f0   :  { %1645 = vmatprep.subr.bf16.mxu1 %v1644_v62  ;;  %1689 = vmatprep.subr.bf16.mxu0 %v1688_v24  ;;  %v1708_v53 = vpack.c.bf16 %v1205_v50, %v1204_v49  ;;  %v1712_v56 = vpack.c.bf16 %v1207_v55, %v1206_v54  ;;  %v1209_v58 = vld [vmem:[#allocation7 + $0x78] sm:$0xff] }
 0x3f1   :  { %1647 = vmatpush3.bf16.msra.mxu1 %v1644_v62  ;;  %1691 = vmatpush3.bf16.msra.mxu0 %v1688_v24  ;;  %v1716_v59 = vpack.c.bf16 %v1209_v58, %v1208_v57 }
 0x3f2   :  { %1649 = vmatprep.subr.bf16.mxu1 %v1648_v63  ;;  %1693 = vmatprep.subr.bf16.mxu0 %v1692_v46 }
 0x3f5   :  { %1651 = vmatpush3.bf16.msra.mxu1 %v1648_v63  ;;  %1695 = vmatpush3.bf16.msra.mxu0 %v1692_v46 }
 0x3f6   :  { %1653 = vmatprep.subr.bf16.mxu1 %v1652_v17  ;;  %1697 = vmatprep.subr.bf16.mxu0 %v1696_v39 }
 0x3f9   :  { %1655 = vmatpush3.bf16.msra.mxu1 %v1652_v17  ;;  %1699 = vmatpush3.bf16.msra.mxu0 %v1696_v39 }
 0x3fa   :  { %1657 = vmatprep.subr.bf16.mxu1 %v1656_v26  ;;  %1701 = vmatprep.subr.bf16.mxu0 %v1700_v43 }
 0x3fc   :  { %1532 = vmatmul.mubr.msk.f32.vlgmr.msra.gmra.mrb[14].mxu1 %vm977_vm0, %v1351_v40 }
 0x3fd   :  { %1659 = vmatpush3.bf16.msra.mxu1 %v1656_v26  ;;  %1703 = vmatpush3.bf16.msra.mxu0 %v1700_v43 }
 0x3fe   :  { %1661 = vmatprep.subr.bf16.mxu1 %v1660_v0  ;;  %1705 = vmatprep.subr.bf16.mxu0 %v1704_v48 }
 0x401   :  { %1663 = vmatpush3.bf16.msra.mxu1 %v1660_v0  ;;  %1707 = vmatpush3.bf16.msra.mxu0 %v1704_v48 }
 0x402   :  { %1665 = vmatprep.subr.bf16.mxu1 %v1664_v16  ;;  %1709 = vmatprep.subr.bf16.mxu0 %v1708_v53 }
 0x405   :  { %1667 = vmatpush3.bf16.msra.mxu1 %v1664_v16  ;;  %1711 = vmatpush3.bf16.msra.mxu0 %v1708_v53 }
 0x406   :  { %1669 = vmatprep.subr.bf16.mxu1 %v1668_v28  ;;  %1713 = vmatprep.subr.bf16.mxu0 %v1712_v56 }
 0x409   :  { %1671 = vmatpush3.bf16.msra.mxu1 %v1668_v28  ;;  %1715 = vmatpush3.bf16.msra.mxu0 %v1712_v56 }
 0x40a   :  { %1673 = vmatprep.subr.bf16.mxu1 %v1672_v5  ;;  %1717 = vmatprep.subr.bf16.mxu0 %v1716_v59 }
 0x40d   :  { %1675 = vmatpush3.bf16.msra.mxu1 %v1672_v5  ;;  %1719 = vmatpush3.bf16.msra.mxu0 %v1716_v59 }
 0x40e   :  { %1677 = vmatprep.subr.bf16.mxu1 %v1676_v8 }
 0x411   :  { %1679 = vmatpush3.bf16.msra.mxu1 %v1676_v8 }
 0x412   :  { %1681 = vmatprep.subr.bf16.mxu1 %v1680_v18 }
 0x415   :  { %1683 = vmatpush3.bf16.msra.mxu1 %v1680_v18 }
 0x416   :  { %1685 = vmatprep.subr.bf16.mxu1 %v1684_v19 }
 0x419   :  { %1687 = vmatpush3.bf16.msra.mxu1 %v1684_v19 }
 0x4cf   :  { %v1533_v21 = vpop.f32.mrb[14].mxu1 }
 0x4d0   :  { %v1060_v29 = vadd.f32 %v1533_v21, %v976_v20  ;;  %v1050_v32 = vpop.f32.mrb[15].mxu1  ;;  %v1356_v20 = vld [vmem:[%s2273_s18] ss:$0 sm:$0xff] }
 0x4d1   :  { %v1059_v23 = vadd.f32 %v1050_v32, %v975_v22 }
 0x4d2   :  { %v1069_v34 = vadd.f32 %v1354_v30, %v1060_v29 }
 0x4d3   :  { %v1068_v33 = vadd.f32 %v1354_v30, %v1059_v23 }
 0x4d5   :  { %1566 = vmatprep.mubr.f32.mxu1 %v1068_v33 }
 0x4d6   :  { %1567 = vmatmul.mubr.f32.vlgmr.msra.gmra.mrb[16].mxu1 %v1069_v34 }
 0x5a9   :  { %v1568_v61 = vpop.f32.mrb[16].mxu1 }
 0x5aa   :  { %v1165_v62 = vadd.f32 %v1568_v61, %v1355_v60  ;;  %v1159_v63 = vpop.f32.mrb[17].mxu1 }
 0x5ab   :  { %v1160_v17 = vadd.f32 %v1355_v60, %v1159_v63 }
 0x5ad   :  { %v1168_v13 = vadd.f32 %v1165_v62, %v1160_v17 }
 0x5af   :  { %v1169_v10 = vrot.slane %v1168_v13, 4 }
 0x5b1   :  { %v1170_v26 = vadd.f32 %v1169_v10, %v1168_v13 }
 0x5b3   :  { %v1171_v31 = vrot.slane %v1170_v26, 2 }
 0x5b5   :  { %v1172_v37 = vadd.f32 %v1171_v31, %v1170_v26 }
 0x5b7   :  { %v1173_v40 = vrot.slane %v1172_v37, 1 }
 0x5b9   :  { %v1174_v0 = vadd.f32 %v1173_v40, %v1172_v37 }
 0x5bb   :  { %v1175_v1 = vmul.f32 0.0625, %v1174_v0 }
 0x5bd   :  { %v1176_v2 = vsub.f32 %v1160_v17, %v1175_v1  ;;  %v1177_v16 = vsub.f32 %v1165_v62, %v1175_v1 }
 0x5bf   :  { %v1178_v25 = vmul.f32 %v1176_v2, %v1176_v2  ;;  %v1179_v27 = vmul.f32 %v1177_v16, %v1177_v16 }
 0x5c1   :  { %v1180_v28 = vadd.f32 %v1179_v27, %v1178_v25 }
 0x5c3   :  { %v1181_v3 = vrot.slane %v1180_v28, 4 }
 0x5c5   :  { %v1182_v4 = vadd.f32 %v1181_v3, %v1180_v28 }
 0x5c7   :  { %v1183_v5 = vrot.slane %v1182_v4, 2 }
 0x5c9   :  { %v1184_v6 = vadd.f32 %v1183_v5, %v1182_v4 }
 0x5cb   :  { %v1185_v7 = vrot.slane %v1184_v6, 1 }
 0x5cd   :  { %v1186_v8 = vadd.f32 %v1185_v7, %v1184_v6 }
 0x5cf   :  { %v1187_v14 = vmul.f32 0.0625, %v1186_v8 }
 0x5d1   :  { %v1188_v9 = vadd.f32 1e-05, %v1187_v14 }
 0x5d3   :  { %1759 = vrsqrt.f32 %v1188_v9 }
 0x5dd   :  { %v1760_v18 = vpop.eup %1759 }
 0x5de   :  { %v1191_v11 = vmul.f32 %v1760_v18, %v1177_v16  ;;  %v1190_v12 = vmul.f32 %v1760_v18, %v1176_v2 }
 0x5e0   :  { %v1193_v19 = vmax.f32 %v1191_v11, 0.0  ;;  %v1192_v15 = vmax.f32 %v1190_v12, 0.0 }
 0x5e2   :  { %1601 = vmatprep.mubr.f32.mxu0 %v1192_v15 }
 0x5e3   :  { %1602 = vmatmul.mubr.f32.vlgmr.msra.gmra.mrb[18].mxu0 %v1193_v19 }
 0x6b6   :  { %v1603_v21 = vpop.f32.mrb[18].mxu0 }
 0x6b7   :  { %v1289_v22 = vadd.f32 %v1603_v21, %v1356_v20  ;;  %v1283_v29 = vpop.f32.mrb[19].mxu0 }
 0x6b8   :  { %v1284_v30 = vadd.f32 %v1356_v20, %v1283_v29 }
 0x6b9   :  { %1293 = vst [vmem:[#allocation9 + $0x8] sm:$0xff] %v1289_v22 }
 0x6ba   :  { %1292 = vst [vmem:[#allocation9] sm:$0xff] %v1284_v30 }
 0x6bb   :  { %1816 = shalt.err (!%p1813_p6)
}
 0x6bc   :  { %s1817_s18 = scalar_lea.hbm %s2274_s19, 256 }
 0x6bd   :  { %p1818_p7 = scmp.ne.s32.totalorder %s2274_s19, %s1817_s18  ;;  %p1821_p8 = scmp.lt.u32.totalorder %s1817_s18, %s2274_s19 }
 0x6bf   :  { %p1823_p9 = pnand %p1821_p8, %p1818_p7 }
 0x6c1   :  { %1826 = shalt.err (!%p1823_p9)
}
 0x6c2   :  { %1305 = dma.vmem_to_hbm [thread:$0]  %s1300_s11, 256, %s2274_s19, [#allocation6], %s1834_s3, %s1834_s3, %s1835_s26  }
 0x6c3   :  { %1831 = dma.done.wait [#allocation6], 256  }
 0x6c4   :  { %1832 = vsyncadd [#allocation6], 4294967040 }
 0x6c5   :  { %1309 = vsyncpa [#allocation5], 1 }
 0x6c6   :  { %1310 = vsyncpa [#allocation8], 1 }
 0x6c7   :  { %1311 = vsyncpa [#allocation6], 1 }

</bundles_post_ra>
